<compile_context>
chip_gen: v6e
topology: v6e:2x2x1
jax: 0.10.0
libtpu: 0.0.40
codegen_flags: <defaults>
</compile_context>

<pallas_src>
import jax
import jax.numpy as jnp
from jax.experimental import pallas as pl
from jax.experimental.pallas import tpu as pltpu


def _clip_kernel(bounds_ref, x_ref, o_ref):
    x = x_ref[...]
    lo = bounds_ref[0].astype(x.dtype)
    hi = bounds_ref[1].astype(x.dtype)
    # x[x < cmin] = cmin ; x[x > cmax] = cmax  ==  clamp
    o_ref[...] = jnp.minimum(jnp.maximum(x, lo), hi)


def _round_up(a, b):
    return -(-a // b) * b


def _chip_config():
    """Per-generation (target_block_bytes, vmem_limit_bytes, num_tensorcores)."""
    kind = ""
    try:
        kind = jax.devices()[0].device_kind.lower()
    except Exception:  # defensive: fall back to conservative settings
        pass
    if "v7" in kind:
        # ~3.2 TB/s per TC: bigger blocks amortize the ~0.35us per-step cost.
        # 8 MiB * 2 buffers * (in + out) = 32 MiB scoped -> raise the limit.
        return 8 * 2**20, 48 * 2**20, 2
    if "v6" in kind:
        # 4 MiB * 4 = 16 MiB, comfortably under v6e's 32 MiB scoped default.
        return 4 * 2**20, None, 1
    # v5e (16 MiB scoped default) and anything unknown: stay conservative.
    return 2 * 2**20, None, 1


def clip(x, clip_range=(0, 1)):
    """Elementwise clamp of `x` to [clip_range[0], clip_range[1]]."""
    cmin, cmax = clip_range
    orig_shape = x.shape
    dtype = x.dtype
    n = int(x.size)
    if n == 0:
        return x

    # TODO(synk): integer dtypes with non-integer clip bounds truncate the
    # bounds to the input dtype; PyTorch's boolean-mask assignment compares in
    # the promoted dtype, so results can differ for e.g. int32 with cmax=0.5.
    itemsize = jnp.dtype(dtype).itemsize
    # Packed sublane count: 8 for 4-byte, 16 for 2-byte, 32 for 1-byte dtypes.
    pack = 8 * max(1, 4 // itemsize)

    target_block_bytes, vmem_limit, num_tc = _chip_config()

    # ---- Choose a lane-dense (rows, lanes) view; free reshape when possible.
    last = orig_shape[-1] if orig_shape else n
    pad_to = None
    if (len(orig_shape) >= 2 and last % 128 == 0
            and last * itemsize * pack <= target_block_bytes):
        lanes = last                      # fast path: collapse leading dims, no pad
    elif n % 512 == 0:
        lanes = 512
    elif n % 256 == 0:
        lanes = 256
    elif n % 128 == 0:
        lanes = 128
    else:
        lanes = 128                       # ragged fallback: minimal pad (<128 elems)
        pad_to = _round_up(n, lanes)

    if pad_to is None:
        rows_total = n // lanes
        x2 = x.reshape(rows_total, lanes)
    else:
        rows_total = pad_to // lanes
        x2 = jnp.pad(x.reshape(-1), (0, pad_to - n)).reshape(rows_total, lanes)

    # ---- Row tile: ~target_block_bytes per block, multiple of `pack`.
    bytes_per_row = lanes * itemsize
    rows_per_block = max(pack, (target_block_bytes // bytes_per_row) // pack * pack)

    if rows_total <= rows_per_block:
        # Single full-array block (always a legal block shape, any alignment).
        rows_per_block = rows_total
        if num_tc >= 2 and rows_total >= 2 * pack:
            # Give both v7x TensorCores a grid step; single-TC chips skip this
            # (an extra serial grid step is pure overhead for a mem-bound op).
            rows_per_block = _round_up(-(-rows_total // 2), pack)

    grid0 = -(-rows_total // rows_per_block)
    # Non-divisible row counts are handled by Pallas edge-block masking —
    # never by an extra padding/slicing pass over HBM.

    bounds = jnp.asarray([cmin, cmax], dtype=jnp.float32)

    compiler_kwargs = dict(dimension_semantics=("parallel",))
    if vmem_limit is not None:
        compiler_kwargs["vmem_limit_bytes"] = vmem_limit

    # TODO(synk): verify via xprof that the single "parallel" axis shards across
    # both v7x TensorCores; if not, add a leading CORE_PARALLEL grid axis.
    # TODO(synk): if callers can donate x (torch clamp_ is in-place), add
    # input_output_aliases={1: 0} to drop the extra HBM output allocation.
    out2 = pl.pallas_call(
        _clip_kernel,
        out_shape=jax.ShapeDtypeStruct((rows_total, lanes), dtype),
        grid_spec=pltpu.PrefetchScalarGridSpec(
            num_scalar_prefetch=0,
            grid=(grid0,),
            in_specs=[
                pl.BlockSpec(memory_space=pltpu.MemorySpace.SMEM),
                pl.BlockSpec((rows_per_block, lanes), lambda i: (i, 0)),
            ],
            out_specs=pl.BlockSpec((rows_per_block, lanes), lambda i: (i, 0)),
        ),
        compiler_params=pltpu.CompilerParams(**compiler_kwargs),
        cost_estimate=pl.CostEstimate(
            flops=2 * n, transcendentals=0, bytes_accessed=2 * n * itemsize),
    )(bounds, x2)

    if pad_to is None:
        return out2.reshape(orig_shape)
    return out2.reshape(-1)[:n].reshape(orig_shape)


if __name__ == "__main__":
    key = jax.random.PRNGKey(0)
    k0, k1, k2, k3 = jax.random.split(key, 4)

    # NCHW input (module's typical use), values both below 0 and above 1.
    x = jax.random.normal(k0, (2, 4, 16, 16), dtype=jnp.float32) * 2.0
    y = jax.block_until_ready(clip(x, (0, 1)))
    assert y.shape == x.shape and y.dtype == x.dtype
    assert bool(jnp.allclose(y, jnp.clip(x, 0.0, 1.0))), "mismatch (small)"

    # Larger input, different range (flatten path, possibly multi-block).
    x2 = jax.random.normal(k1, (4, 8, 64, 64), dtype=jnp.float32) * 3.0
    y2 = jax.block_until_ready(clip(x2, (-0.5, 0.5)))
    assert y2.shape == x2.shape and y2.dtype == x2.dtype
    assert bool(jnp.allclose(y2, jnp.clip(x2, -0.5, 0.5))), "mismatch (large)"

    # Fast path: trailing dim is a multiple of 128 -> no flatten, no pad.
    x3 = jax.random.normal(k2, (2, 8, 256), dtype=jnp.bfloat16) * 2.0
    y3 = jax.block_until_ready(clip(x3, (0, 1)))
    assert y3.shape == x3.shape and y3.dtype == x3.dtype
    assert bool(jnp.allclose(y3.astype(jnp.float32),
                             jnp.clip(x3, 0, 1).astype(jnp.float32))), "mismatch (bf16)"

    # Ragged size (n % 128 != 0) exercises the minimal-pad fallback.
    x4 = jax.random.normal(k3, (3, 5, 7), dtype=jnp.float32) * 2.0
    y4 = jax.block_until_ready(clip(x4, (-1.0, 0.25)))
    assert y4.shape == x4.shape and y4.dtype == x4.dtype
    assert bool(jnp.allclose(y4, jnp.clip(x4, -1.0, 0.25))), "mismatch (ragged)"

    print("KERNEL_OK")
</pallas_src>

<mosaic_0001>
module attributes {stable_mosaic.version = 11 : i64} {
  func.func @_clip_kernel(%arg0: i32, %arg1: memref<2xf32, #tpu.memory_space<smem>>, %arg2: memref<4x512xf32, #tpu.memory_space<vmem>>, %arg3: memref<4x512xf32, #tpu.memory_space<vmem>>) attributes {dimension_semantics = [#tpu.dimension_semantics<parallel>], iteration_bounds = array<i64: 1>, scalar_prefetch = 0 : i64, scratch_operands = 0 : i64, tpu.core_type = #tpu.core_type<tc>, window_params = [{transform_indices = @transform_0, window_bounds = array<i64: 2>}, {transform_indices = @transform_1, window_bounds = array<i64: 4, 512>}, {transform_indices = @transform_2, window_bounds = array<i64: 4, 512>}]} {
    %c0 = arith.constant 0 : index
    %c0_0 = arith.constant 0 : index
    %0 = vector.load %arg2[%c0, %c0_0] : memref<4x512xf32, #tpu.memory_space<vmem>>, vector<4x512xf32>
    %c0_1 = arith.constant 0 : index
    %1 = memref.load %arg1[%c0_1] : memref<2xf32, #tpu.memory_space<smem>>
    %c1 = arith.constant 1 : index
    %2 = memref.load %arg1[%c1] : memref<2xf32, #tpu.memory_space<smem>>
    %3 = vector.broadcast %1 : f32 to vector<4x512xf32>
    %4 = arith.maximumf %0, %3 : vector<4x512xf32>
    %5 = vector.broadcast %2 : f32 to vector<4x512xf32>
    %6 = arith.minimumf %4, %5 : vector<4x512xf32>
    %c0_2 = arith.constant 0 : index
    %c0_3 = arith.constant 0 : index
    %7 = vector.load %arg3[%c0_2, %c0_3] : memref<4x512xf32, #tpu.memory_space<vmem>>, vector<4x512xf32>
    tpu.vector_store %arg3[%c0_2, %c0_3], %6 {strides = array<i32>} : memref<4x512xf32, #tpu.memory_space<vmem>>, vector<4x512xf32>,
    return
  }
  func.func @transform_0(%arg0: i32) -> i32 {
    %c0_i32 = arith.constant 0 : i32
    %c0_i32_0 = arith.constant 0 : i32
    return %c0_i32 : i32
  }
  func.func @transform_1(%arg0: i32) -> (i32, i32) {
    %c0_i32 = arith.constant 0 : i32
    %c0_i32_0 = arith.constant 0 : i32
    return %arg0, %c0_i32 : i32, i32
  }
  func.func @transform_2(%arg0: i32) -> (i32, i32) {
    %c0_i32 = arith.constant 0 : i32
    %c0_i32_0 = arith.constant 0 : i32
    return %arg0, %c0_i32 : i32, i32
  }
}

</mosaic_0001>

<bundles_post_ra>
// kernel: tpu_custom_call.1
= control target key start
LH: loop header
LB: loop body
LE: loop exit
PB: predicated region body
PF: predicated region fallthrough
CT: control target
= control target key end

     0   :  { %7 = vsyncpa [#allocation5], 0  ;;  %s148_s0 = inlined_call_operand.hbm [shape: f32[2], index: 0, kind: input, shape index: {}]   ;;  %s149_s1 = inlined_call_operand.hbm [shape: f32[4,512], index: 1, kind: input, shape index: {}]   ;;  %s150_s2 = inlined_call_operand.hbm [shape: f32[4,512], index: 2, kind: output, shape index: {}]  }
   0x1   :  { %8 = vsyncpa [#allocation3], 0 }
   0x2   :  { %9 = vsyncpa [#allocation4], 0  ;;  %s121_s9 = smov [#allocation2]   ;;  %s122_s12 = smov [#allocation6]  }
   0x3   :  { %17 = dma.hbm_to_smem %s148_s0, 16, %s121_s9, [#allocation5]  }
   0x4   :  { %s24_s13 = sshll.u32 %s122_s12, 4  ;;  %s25_s13 = int_to_ptr.vmem [resolvable:$true] %s24_s13 }
   0x5   :  { %s83_s14 = scalar_lea.vmem %s25_s13, 256  ;;  %p88_p1 = scmp.lt.s32.totalorder %s25_s13, %s25_s13 }
   0x6   :  { %p84_p0 = scmp.ne.s32.totalorder %s25_s13, %s83_s14  ;;  %p89_p2 = scmp.lt.s32.totalorder %s83_s14, %s83_s14 }
   0x8   :  { %p90_p3 = por %p89_p2, %p88_p1 }
   0xa   :  { %p91_p4 = pnand %p90_p3, %p84_p0 }
   0xc   :  { %94 = shalt.err (!%p91_p4)
}
   0xd   :  { %27 = dma.hbm_to_vmem [thread:$0]  %s149_s1, 256, %s25_s13, [#allocation3]  }
   0xe   :  { %115 = dma.done.wait [#allocation5], 16  }
   0xf   :  { %116 = vsyncadd [#allocation5], 4294967280 }
  0x10   :  { %117 = dma.done.wait [#allocation3], 256  }
  0x11   :  { %118 = vsyncadd [#allocation3], 4294967040 }
  0x12   :  { %34 = sfence }
  0x13   :  { %s37_s0 = sld [smem:[#allocation2]]  ;;  %v35_v0 = vld [vmem:[#allocation6] sm:$0xff]  ;;  %v36_v1 = vld [vmem:[#allocation6 + $0x8] sm:$0xff]  ;;  %s123_s18 = smov [#allocation7]  }
  0x14   :  { %s63_s17 = sld [smem:[#allocation2 + $0x1]]  ;;  %s53_s19 = sshll.u32 %s123_s18, 4  ;;  %s54_s19 = int_to_ptr.vmem [resolvable:$true] %s53_s19 }
  0x15   :  { %s95_s1 = scalar_lea.vmem %s54_s19, 256  ;;  %p100_p6 = scmp.lt.s32.totalorder %s54_s19, %s54_s19 }
  0x16   :  { %p96_p5 = scmp.ne.s32.totalorder %s54_s19, %s95_s1  ;;  %p101_p7 = scmp.lt.s32.totalorder %s95_s1, %s95_s1 }
  0x18   :  { %p102_p8 = por %p101_p7, %p100_p6 }
  0x19   :  { %v39_v2 = vstv %s37_s0 }
  0x1a   :  { %v40_v3 = vmax.f32 %v35_v0, %v39_v2  ;;  %v42_v4 = vstv %s63_s17  ;;  %v41_v5 = vmax.f32 %v36_v1, %v39_v2  ;;  %p103_p9 = pnand %p102_p8, %p96_p5 }
  0x1c   :  { %v43_v6 = vmin.f32 %v40_v3, %v42_v4  ;;  %v44_v7 = vmin.f32 %v41_v5, %v42_v4 }
  0x1e   :  { %45 = vst [vmem:[#allocation7] sm:$0xff] %v43_v6  ;;  %46 = vst [vmem:[#allocation7 + $0x8] sm:$0xff] %v44_v7 }
  0x1f   :  { %106 = shalt.err (!%p103_p9)
}
  0x20   :  { %56 = dma.vmem_to_hbm [thread:$0]  %s54_s19, 256, %s150_s2, [#allocation4]  }
  0x21   :  { %119 = dma.done.wait [#allocation4], 256  }
  0x22   :  { %120 = vsyncadd [#allocation4], 4294967040 }
  0x23   :  { %60 = vsyncpa [#allocation3], 1 }
  0x24   :  { %61 = vsyncpa [#allocation4], 1 }
  0x25   :  { %62 = vsyncpa [#allocation5], 1 }

</bundles_post_ra>
